<compile_context>
chip_gen: v5e
topology: v5e:2x2
jax: 0.10.0
libtpu: 0.0.40
codegen_flags: <defaults>
</compile_context>

<pallas_src>
import functools

import jax
import jax.numpy as jnp
from jax import lax
from jax.experimental import pallas as pl
from jax.experimental.pallas import tpu as pltpu


def _infonce_kernel(q_ref, k_ref, queue_ref, out_ref,
                    m_ref, s_ref, pos_ref, qsc_ref,
                    *, inv_temp, use_bf16_exp, k_valid):
    """One (row-block, queue-block) grid step of the online-logsumexp InfoNCE."""
    kk = pl.program_id(1)
    nk = pl.num_programs(1)
    tk = queue_ref.shape[1]

    @pl.when(kk == 0)
    def _init():
        # Fold temperature into q once per row-block; cache the bf16 MXU operand.
        q32 = q_ref[...].astype(jnp.float32) * inv_temp          # (tn, C) f32, scaled
        qsc_ref[...] = q32.astype(jnp.bfloat16)                  # cached MXU operand
        # Positive logit (rowwise dot q.k) in f32; seeds the running max so the
        # logsumexp always includes the positive class (label 0).
        pos = jnp.sum(q32 * k_ref[...].astype(jnp.float32), axis=1, keepdims=True)
        pos_ref[...] = pos
        m_ref[...] = pos                                          # running max
        s_ref[...] = jnp.ones_like(s_ref)                         # exp(pos - pos) == 1

    # Negative logits for this queue tile: bf16 operands, f32 accumulation on the MXU.
    # Queue tile is (C, tk) — canonical orientation, no in-kernel transpose.
    neg = jnp.dot(qsc_ref[...], queue_ref[...],
                  preferred_element_type=jnp.float32)             # (tn, tk) f32

    if k_valid is not None:
        # Mask padded queue columns (K was padded up to a multiple of 128).
        col = kk * tk + lax.broadcasted_iota(jnp.int32, (1, tk), 1)
        neg = jnp.where(col < k_valid, neg, jnp.float32(-1e30))

    # Online logsumexp update ((tn,1) state stays f32).
    m_prev = m_ref[...]
    m_new = jnp.maximum(m_prev, jnp.max(neg, axis=1, keepdims=True))
    shifted = neg - m_new
    if use_bf16_exp:
        # v6e/v7x: bf16 EUP exp (~2x f32), f32 accumulation of the row-sum on the MXU
        # (MXU is nearly idle here; keeps VALU/XLU slack once the EUP is halved).
        p = jnp.exp(shifted.astype(jnp.bfloat16))                 # (tn, tk) bf16
        ones = jnp.ones((tk, 1), jnp.bfloat16)
        tile_sum = jnp.dot(p, ones, preferred_element_type=jnp.float32)   # (tn, 1) f32
    else:
        # v5e (no bf16 EUP): f32 exp + VPU/XLU reduction.
        tile_sum = jnp.sum(jnp.exp(shifted), axis=1, keepdims=True)
    s_ref[...] = s_ref[...] * jnp.exp(m_prev - m_new) + tile_sum
    m_ref[...] = m_new

    @pl.when(kk == nk - 1)
    def _finalize():
        # loss_i = logsumexp(logits_i) - pos_i   (cross entropy with label 0)
        lse = m_ref[...] + jnp.log(s_ref[...])
        out_ref[...] = lse - pos_ref[...]         # (tn, 1), written once per row-block


def _pick_tile(dim, max_tile, quantum):
    """Largest tile <= max_tile that divides `dim` and is a multiple of `quantum`.
    `dim` is always pre-padded to a multiple of `quantum`, so this never falls back
    to the full axis unintentionally."""
    if dim <= max_tile:
        return dim
    t = (max_tile // quantum) * quantum
    while t >= quantum:
        if dim % t == 0:
            return t
        t -= quantum
    return dim


def _round_up(x, q):
    return ((x + q - 1) // q) * q


def infonce_loss(q, k, queue, temp_f, *, tn_max=None, tk_max=None):
    """q: (N, C), k: (N, C), queue: (K, C). Returns the scalar mean CE loss."""
    N, C = q.shape
    K, C2 = queue.shape
    assert C2 == C and k.shape == (N, C)

    kind = ""
    try:
        kind = jax.devices()[0].device_kind.lower()
    except Exception:
        pass
    # bf16 EUP exp only on v6e / v7x (v5e's EUP has no bf16 path).
    use_bf16_exp = ("v6" in kind) or ("v7" in kind)

    if tn_max is None:
        tn_max = 512 if use_bf16_exp else 256      # v5e: conservative (16 MiB scoped VMEM)
    if tk_max is None:
        tk_max = 4096 if use_bf16_exp else 2048
    # v7x has 2 TensorCores/chip: make sure the "parallel" N axis has >= 2 blocks.
    if "v7" in kind and N >= 16:
        tn_max = min(tn_max, max(8, (N // 2) // 8 * 8))

    inv_temp = float(1.0 / temp_f)

    # Pad N to a multiple of 8 (sublanes) and K to a multiple of 128 (lanes) so tile
    # picking always finds a clean divisor. Padded K columns are masked in-kernel,
    # padded N rows are dropped before the mean.
    N_pad = _round_up(N, 8)
    K_pad = _round_up(K, 128)

    # bf16 storage / MXU operands (halves the dominant HBM byte stream: the queue).
    qb = q.astype(jnp.bfloat16)
    kb = k.astype(jnp.bfloat16)
    if N_pad != N:
        qb = jnp.pad(qb, ((0, N_pad - N), (0, 0)))
        kb = jnp.pad(kb, ((0, N_pad - N), (0, 0)))
    # Stream the queue in MXU-canonical (C, K) orientation (lane axis = K). In a real
    # MoCo setup the persistent queue would be stored this way once.
    queue_ct = jnp.transpose(queue).astype(jnp.bfloat16)          # (C, K)
    if K_pad != K:
        queue_ct = jnp.pad(queue_ct, ((0, 0), (0, K_pad - K)))

    tn = _pick_tile(N_pad, tn_max, 8)        # row block (second-minor: multiple of 8)
    tk = _pick_tile(K_pad, tk_max, 128)      # queue block (lanes, streamed/double-buffered)
    num_n = N_pad // tn
    num_k = K_pad // tk

    kernel = functools.partial(
        _infonce_kernel,
        inv_temp=inv_temp,
        use_bf16_exp=use_bf16_exp,
        k_valid=(K if K_pad != K else None),
    )

    cost = pl.CostEstimate(
        flops=2 * N_pad * K_pad * C + 2 * N_pad * C,
        transcendentals=N_pad * K_pad,
        bytes_accessed=(C * K_pad * 2) * num_n + 2 * N_pad * C * 2 + N_pad * 4,
    )

    per_row = pl.pallas_call(
        kernel,
        out_shape=jax.ShapeDtypeStruct((N_pad, 1), jnp.float32),
        grid=(num_n, num_k),                                # K (reduction) axis last
        in_specs=[
            pl.BlockSpec((tn, C), lambda ni, kk: (ni, 0)),  # q row block (resident per ni)
            pl.BlockSpec((tn, C), lambda ni, kk: (ni, 0)),  # k row block (resident per ni)
            pl.BlockSpec((C, tk), lambda ni, kk: (0, kk)),  # queue tile, streamed over K
        ],
        # Per-row losses; written once per row-block at the final K step.
        out_specs=pl.BlockSpec((tn, 1), lambda ni, kk: (ni, 0)),
        scratch_shapes=[
            pltpu.VMEM((tn, 1), jnp.float32),    # running max m
            pltpu.VMEM((tn, 1), jnp.float32),    # running sum s
            pltpu.VMEM((tn, 1), jnp.float32),    # positive logit
            pltpu.VMEM((tn, C), jnp.bfloat16),   # cached temperature-folded bf16 q
        ],
        compiler_params=pltpu.CompilerParams(
            dimension_semantics=("parallel", "arbitrary"),
        ),
        cost_estimate=cost,
    )(qb, kb, queue_ct)

    # Mean reduction in the wrapper (keeps the N axis freely parallel in-kernel).
    return jnp.mean(per_row[:N, 0])


def infonce_loss_ref(q, k, queue, temp_f, match_kernel_precision=False):
    """Pure-JAX reference. With match_kernel_precision=True it mirrors the kernel's
    bf16-operand / f32-accumulation choices; otherwise it is the plain f32 module."""
    inv_temp = 1.0 / temp_f
    if match_kernel_precision:
        qf = q.astype(jnp.bfloat16).astype(jnp.float32)
        kf = k.astype(jnp.bfloat16).astype(jnp.float32)
        queue_b = queue.astype(jnp.bfloat16)
        qs = qf * inv_temp
        l_pos = jnp.sum(qs * kf, axis=1, keepdims=True)
        l_neg = lax.dot_general(
            qs.astype(jnp.bfloat16), queue_b,
            dimension_numbers=(((1,), (1,)), ((), ())),
            preferred_element_type=jnp.float32,
        )
    else:
        qf = q.astype(jnp.float32)
        kf = k.astype(jnp.float32)
        Qf = queue.astype(jnp.float32)
        l_pos = jnp.sum(qf * kf, axis=1, keepdims=True) * inv_temp
        l_neg = (qf @ Qf.T) * inv_temp
    logits = jnp.concatenate([l_pos, l_neg], axis=1)
    return -jnp.mean(jax.nn.log_softmax(logits, axis=1)[:, 0])


def _run_case(key, N, C, K, temp_f):
    kq, kk_, kqueue = jax.random.split(key, 3)
    q = jax.random.normal(kq, (N, C), dtype=jnp.float32)
    k = jax.random.normal(kk_, (N, C), dtype=jnp.float32)
    queue = jax.random.normal(kqueue, (K, C), dtype=jnp.float32)
    # MoCo-style L2-normalized features (realistic logit range for temp=0.07).
    q = q / jnp.linalg.norm(q, axis=1, keepdims=True)
    k = k / jnp.linalg.norm(k, axis=1, keepdims=True)
    queue = queue / jnp.linalg.norm(queue, axis=1, keepdims=True)

    loss = jax.block_until_ready(infonce_loss(q, k, queue, temp_f))
    ref_matched = jax.block_until_ready(
        infonce_loss_ref(q, k, queue, temp_f, match_kernel_precision=True))
    ref_f32 = jax.block_until_ready(
        infonce_loss_ref(q, k, queue, temp_f, match_kernel_precision=False))

    # Matched-precision check (validates kernel logic; loose enough for the bf16-exp
    # path on v6e/v7x), plus a looser check against the plain f32 module.
    assert jnp.allclose(loss, ref_matched, rtol=2e-2, atol=2e-2), (loss, ref_matched)
    assert jnp.allclose(loss, ref_f32, rtol=5e-2, atol=5e-2), (loss, ref_f32)
    return loss


if __name__ == "__main__":
    temp_f = 0.07  # args.temp_f (the module's only hyperparameter)
    key = jax.random.PRNGKey(0)
    key_a, key_b = jax.random.split(key)

    # Small deterministic example: batch N=8, feature dim C=32, queue K=128.
    _run_case(key_a, N=8, C=32, K=128, temp_f=temp_f)
    # Ragged case exercising the padding / column-masking path.
    _run_case(key_b, N=6, C=32, K=100, temp_f=temp_f)

    print("KERNEL_OK")
</pallas_src>

<mosaic_0001>
module attributes {stable_mosaic.version = 11 : i64} {
  func.func @_infonce_kernel(%arg0: i32, %arg1: i32, %arg2: memref<8x32xbf16, #tpu.memory_space<vmem>>, %arg3: memref<8x32xbf16, #tpu.memory_space<vmem>>, %arg4: memref<32x128xbf16, #tpu.memory_space<vmem>>, %arg5: memref<8x1xf32, #tpu.memory_space<vmem>>, %arg6: memref<8x1xf32, #tpu.memory_space<vmem>>, %arg7: memref<8x1xf32, #tpu.memory_space<vmem>>, %arg8: memref<8x1xf32, #tpu.memory_space<vmem>>, %arg9: memref<8x32xbf16, #tpu.memory_space<vmem>>) attributes {dimension_semantics = [#tpu.dimension_semantics<parallel>, #tpu.dimension_semantics<arbitrary>], iteration_bounds = array<i64: 1, 1>, scalar_prefetch = 0 : i64, scratch_operands = 4 : i64, tpu.core_type = #tpu.core_type<tc>, window_params = [{transform_indices = @transform_0, window_bounds = array<i64: 8, 32>}, {transform_indices = @transform_1, window_bounds = array<i64: 8, 32>}, {transform_indices = @transform_2, window_bounds = array<i64: 32, 128>}, {transform_indices = @transform_3, window_bounds = array<i64: 8, 1>}]} {
    %c0_i32 = arith.constant 0 : i32
    %0 = arith.cmpi eq, %arg1, %c0_i32 : i32
    %1 = arith.extui %0 : i1 to i32
    %c0_i32_0 = arith.constant 0 : i32
    %2 = arith.cmpi ne, %1, %c0_i32_0 : i32
    scf.if %2 {
      %c0_16 = arith.constant 0 : index
      %c0_17 = arith.constant 0 : index
      %25 = vector.load %arg2[%c0_16, %c0_17] : memref<8x32xbf16, #tpu.memory_space<vmem>>, vector<8x32xbf16>
      %26 = arith.extf %25 : vector<8x32xbf16> to vector<8x32xf32>
      %cst_18 = arith.constant 14.2857141 : f32
      %27 = vector.broadcast %cst_18 : f32 to vector<8x32xf32>
      %28 = arith.mulf %26, %27 : vector<8x32xf32>
      %29 = arith.truncf %28 : vector<8x32xf32> to vector<8x32xbf16>
      %c0_19 = arith.constant 0 : index
      %c0_20 = arith.constant 0 : index
      %30 = vector.load %arg9[%c0_19, %c0_20] : memref<8x32xbf16, #tpu.memory_space<vmem>>, vector<8x32xbf16>
      tpu.vector_store %arg9[%c0_19, %c0_20], %29 {strides = array<i32>} : memref<8x32xbf16, #tpu.memory_space<vmem>>, vector<8x32xbf16>,
      %c0_21 = arith.constant 0 : index
      %c0_22 = arith.constant 0 : index
      %31 = vector.load %arg3[%c0_21, %c0_22] : memref<8x32xbf16, #tpu.memory_space<vmem>>, vector<8x32xbf16>
      %32 = arith.extf %31 : vector<8x32xbf16> to vector<8x32xf32>
      %33 = arith.mulf %28, %32 : vector<8x32xf32>
      %cst_23 = arith.constant dense<0.000000e+00> : vector<8xf32>
      %34 = vector.multi_reduction <add>, %33, %cst_23 [1] : vector<8x32xf32> to vector<8xf32>
      %35 = vector.shape_cast %34 : vector<8xf32> to vector<8x1xf32>
      %c0_24 = arith.constant 0 : index
      %c0_25 = arith.constant 0 : index
      %36 = vector.load %arg8[%c0_24, %c0_25] : memref<8x1xf32, #tpu.memory_space<vmem>>, vector<8x1xf32>
      tpu.vector_store %arg8[%c0_24, %c0_25], %35 {strides = array<i32>} : memref<8x1xf32, #tpu.memory_space<vmem>>, vector<8x1xf32>,
      %c0_26 = arith.constant 0 : index
      %c0_27 = arith.constant 0 : index
      %37 = vector.load %arg6[%c0_26, %c0_27] : memref<8x1xf32, #tpu.memory_space<vmem>>, vector<8x1xf32>
      tpu.vector_store %arg6[%c0_26, %c0_27], %35 {strides = array<i32>} : memref<8x1xf32, #tpu.memory_space<vmem>>, vector<8x1xf32>,
      %cst_28 = arith.constant 1.000000e+00 : f32
      %38 = vector.broadcast %cst_28 : f32 to vector<8x1xf32>
      %c0_29 = arith.constant 0 : index
      %c0_30 = arith.constant 0 : index
      %39 = vector.load %arg7[%c0_29, %c0_30] : memref<8x1xf32, #tpu.memory_space<vmem>>, vector<8x1xf32>
      tpu.vector_store %arg7[%c0_29, %c0_30], %38 {strides = array<i32>} : memref<8x1xf32, #tpu.memory_space<vmem>>, vector<8x1xf32>,
    } else {
    }
    %c0 = arith.constant 0 : index
    %c0_1 = arith.constant 0 : index
    %3 = vector.load %arg9[%c0, %c0_1] : memref<8x32xbf16, #tpu.memory_space<vmem>>, vector<8x32xbf16>
    %c0_2 = arith.constant 0 : index
    %c0_3 = arith.constant 0 : index
    %4 = vector.load %arg4[%c0_2, %c0_3] : memref<32x128xbf16, #tpu.memory_space<vmem>>, vector<32x128xbf16>
    %cst = arith.constant dense<0.000000e+00> : vector<8x128xf32>
    %5 = tpu.matmul %3, %4, %cst {dimension_numbers = #tpu.dot_dimension_numbers<[1], [0], [0], [1], [0, 0, 1, 1], [], []>} : vector<8x32xbf16>, vector<32x128xbf16>, vector<8x128xf32> -> vector<8x128xf32>
    %c0_4 = arith.constant 0 : index
    %c0_5 = arith.constant 0 : index
    %6 = vector.load %arg6[%c0_4, %c0_5] : memref<8x1xf32, #tpu.memory_space<vmem>>, vector<8x1xf32>
    %cst_6 = arith.constant dense<0xFF800000> : vector<8xf32>
    %7 = vector.multi_reduction <maximumf>, %5, %cst_6 [1] : vector<8x128xf32> to vector<8xf32>
    %8 = vector.shape_cast %7 : vector<8xf32> to vector<8x1xf32>
    %9 = arith.maximumf %6, %8 : vector<8x1xf32>
    %10 = vector.broadcast %9 : vector<8x1xf32> to vector<8x128xf32>
    %11 = arith.subf %5, %10 : vector<8x128xf32>
    %12 = math.exp %11 : vector<8x128xf32>
    %cst_7 = arith.constant dense<0.000000e+00> : vector<8xf32>
    %13 = vector.multi_reduction <add>, %12, %cst_7 [1] : vector<8x128xf32> to vector<8xf32>
    %14 = vector.shape_cast %13 : vector<8xf32> to vector<8x1xf32>
    %c0_8 = arith.constant 0 : index
    %c0_9 = arith.constant 0 : index
    %15 = vector.load %arg7[%c0_8, %c0_9] : memref<8x1xf32, #tpu.memory_space<vmem>>, vector<8x1xf32>
    %16 = arith.subf %6, %9 : vector<8x1xf32>
    %17 = math.exp %16 : vector<8x1xf32>
    %18 = arith.mulf %15, %17 : vector<8x1xf32>
    %19 = arith.addf %18, %14 : vector<8x1xf32>
    %c0_10 = arith.constant 0 : index
    %c0_11 = arith.constant 0 : index
    %20 = vector.load %arg7[%c0_10, %c0_11] : memref<8x1xf32, #tpu.memory_space<vmem>>, vector<8x1xf32>
    tpu.vector_store %arg7[%c0_10, %c0_11], %19 {strides = array<i32>} : memref<8x1xf32, #tpu.memory_space<vmem>>, vector<8x1xf32>,
    %c0_12 = arith.constant 0 : index
    %c0_13 = arith.constant 0 : index
    %21 = vector.load %arg6[%c0_12, %c0_13] : memref<8x1xf32, #tpu.memory_space<vmem>>, vector<8x1xf32>
    tpu.vector_store %arg6[%c0_12, %c0_13], %9 {strides = array<i32>} : memref<8x1xf32, #tpu.memory_space<vmem>>, vector<8x1xf32>,
    %c0_i32_14 = arith.constant 0 : i32
    %22 = arith.cmpi eq, %arg1, %c0_i32_14 : i32
    %23 = arith.extui %22 : i1 to i32
    %c0_i32_15 = arith.constant 0 : i32
    %24 = arith.cmpi ne, %23, %c0_i32_15 : i32
    scf.if %24 {
      %c0_16 = arith.constant 0 : index
      %c0_17 = arith.constant 0 : index
      %25 = vector.load %arg6[%c0_16, %c0_17] : memref<8x1xf32, #tpu.memory_space<vmem>>, vector<8x1xf32>
      %c0_18 = arith.constant 0 : index
      %c0_19 = arith.constant 0 : index
      %26 = vector.load %arg7[%c0_18, %c0_19] : memref<8x1xf32, #tpu.memory_space<vmem>>, vector<8x1xf32>
      %27 = math.log %26 : vector<8x1xf32>
      %28 = arith.addf %25, %27 : vector<8x1xf32>
      %c0_20 = arith.constant 0 : index
      %c0_21 = arith.constant 0 : index
      %29 = vector.load %arg8[%c0_20, %c0_21] : memref<8x1xf32, #tpu.memory_space<vmem>>, vector<8x1xf32>
      %30 = arith.subf %28, %29 : vector<8x1xf32>
      %c0_22 = arith.constant 0 : index
      %c0_23 = arith.constant 0 : index
      %31 = vector.load %arg5[%c0_22, %c0_23] : memref<8x1xf32, #tpu.memory_space<vmem>>, vector<8x1xf32>
      tpu.vector_store %arg5[%c0_22, %c0_23], %30 {strides = array<i32>} : memref<8x1xf32, #tpu.memory_space<vmem>>, vector<8x1xf32>,
    } else {
    }
    return
  }
  func.func @transform_0(%arg0: i32, %arg1: i32) -> (i32, i32) {
    %c0_i32 = arith.constant 0 : i32
    %c0_i32_0 = arith.constant 0 : i32
    return %arg0, %c0_i32 : i32, i32
  }
  func.func @transform_1(%arg0: i32, %arg1: i32) -> (i32, i32) {
    %c0_i32 = arith.constant 0 : i32
    %c0_i32_0 = arith.constant 0 : i32
    return %arg0, %c0_i32 : i32, i32
  }
  func.func @transform_2(%arg0: i32, %arg1: i32) -> (i32, i32) {
    %c0_i32 = arith.constant 0 : i32
    %c0_i32_0 = arith.constant 0 : i32
    return %c0_i32, %arg1 : i32, i32
  }
  func.func @transform_3(%arg0: i32, %arg1: i32) -> (i32, i32) {
    %c0_i32 = arith.constant 0 : i32
    %c0_i32_0 = arith.constant 0 : i32
    return %arg0, %c0_i32 : i32, i32
  }
}

</mosaic_0001>

<bundles_post_ra>
// kernel: tpu_custom_call.1
= control target key start
LH: loop header
LB: loop body
LE: loop exit
PB: predicated region body
PF: predicated region fallthrough
CT: control target
= control target key end

     0   :  { %8 = vsyncpa [#allocation7], 0  ;;  %s300_s0 = inlined_call_operand.hbm [shape: bf16[8,32], index: 0, kind: input, shape index: {}]   ;;  %s301_s1 = inlined_call_operand.hbm [shape: bf16[8,32], index: 1, kind: input, shape index: {}]   ;;  %s302_s2 = inlined_call_operand.hbm [shape: bf16[32,128], index: 2, kind: input, shape index: {}]   ;;  %s303_s3 = inlined_call_operand.vmem [shape: f32[8,1], index: 3, kind: output, shape index: {}]  }
   0x1   :  { %9 = vsyncpa [#allocation9], 0  ;;  %s26_s14 = sshll.u32 %s301_s1, 4  ;;  %s255_s15 = smov [#allocation8]   ;;  %s27_s14 = int_to_ptr.hbm [resolvable:$true] %s26_s14 }
   0x2   :  { %s28_s16 = sshll.u32 %s255_s15, 4  ;;  %s15_s19 = sshll.u32 %s300_s0, 4  ;;  %s29_s16 = int_to_ptr.vmem [resolvable:$true] %s28_s16  ;;  %s16_s19 = int_to_ptr.hbm [resolvable:$true] %s15_s19 }
   0x3   :  { %31 = dma.hbm_to_vmem [thread:$0]  %s27_s14, 64, %s29_s16, [#allocation9]  }
   0x4   :  { %s256_s20 = smov [#allocation6]   ;;  %s36_s24 = sshll.u32 %s302_s2, 4  ;;  %s37_s24 = int_to_ptr.hbm [resolvable:$true] %s36_s24 }
   0x5   :  { %s17_s21 = sshll.u32 %s256_s20, 4  ;;  %s257_s1 = smov [#allocation10]   ;;  %s18_s21 = int_to_ptr.vmem [resolvable:$true] %s17_s21 }
   0x6   :  { %20 = dma.hbm_to_vmem [thread:$0]  %s16_s19, 64, %s18_s21, [#allocation7]  }
   0x7   :  { %s38_s25 = sshll.u32 %s257_s1, 4  ;;  %s258_s26 = smov 64   ;;  %s39_s25 = int_to_ptr.vmem [resolvable:$true] %s38_s25 }
   0x8   :  { %s259_s27 = smov 4  }
   0x9   :  { %44 = dma.hbm_to_vmem [thread:$0]  %s37_s24, 256, %s39_s25, [#allocation9], %s258_s26, %s258_s26, %s259_s27  }
   0xa   :  { %251 = dma.done.wait [#allocation7], 64  }
   0xb   :  { %252 = vsyncadd [#allocation7], 4294967232 }
   0xc   :  { %253 = dma.done.wait [#allocation9], 320  }
   0xd   :  { %254 = vsyncadd [#allocation9], 4294966976  ;;  %v163_v0 = vld [vmem:[#allocation10 + $0x8] sm:$0xff]  ;;  %v62_v1 = vld [vmem:[#allocation6] sm:$0xf]  ;;  %vm66_vm0 = vcmask 257024  }
   0xe   :  { %v63_v2 = vunpack.c.l.bf16 %v62_v1  ;;  %v68_v3 = vld [vmem:[#allocation8] sm:$0xf]  ;;  %106 = vmatpush.bf16.msra.mxu0 %v163_v0  ;;  %v162_v4 = vld [vmem:[#allocation10] sm:$0xff]  ;;  %vm71_vm1 = vcmask 261120   ;;  %vm75_vm2 = vcmask 7168   ;;  %v260_v14 = vmov 0  }
   0xf   :  { %v69_v5 = vunpack.c.l.bf16 %v68_v3  ;;  %171 = vset.pattern.permute.xlu1 %v260_v14  ;;  %172 = vset.pattern.permute.xlu0 %v260_v14  ;;  %v261_v15 = vmov 1.0  }
  0x10   :  { %v64_v6 = vmul.f32 14.285714, %v63_v2  ;;  %78 = vst.msk [vmem:[#allocation3] sm:$0xff] %vm75_vm2, %v261_v15 }
  0x12   :  { %v65_v7 = vpack.c.bf16 %v64_v6, %v64_v6  ;;  %v70_v8 = vmul.f32 %v69_v5, %v64_v6  ;;  %107 = vmatpush.bf16.msra.mxu0 %v162_v4 }
  0x14   :  { %67 = vst.msk [vmem:[#allocation5] sm:$0xf] %vm66_vm0, %v65_v7  ;;  %v72_v9 = vsel %vm71_vm1, %v70_v8, 0.0 }
  0x15   :  { %73 = vadd.xlane.f32.xlu0 %v72_v9 }
  0x17   :  { %v127_v26 = vld [vmem:[#allocation3] sm:$0xff] }
  0x1b   :  { %v79_v10 = vld [vmem:[#allocation5] sm:$0xf] }
  0x1c   :  { %161 = vmatmul.msk.bf16.vlgmr.msra.gmra.mxu0 %vm71_vm1, %v79_v10 }
  0x88   :  { %v74_v11 = vpop.xlane.xlu0 %73 }
  0x89   :  { %76 = vst.msk [vmem:[#allocation4] sm:$0xff] %vm75_vm2, %v74_v11 }
  0x8a   :  { %77 = vst.msk [vmem:[#allocation2] sm:$0xff] %vm75_vm2, %v74_v11 }
  0x90   :  { %v144_v35 = vld [vmem:[#allocation4] sm:$0xff] }
  0x91   :  { %v113_v16 = vld [vmem:[#allocation2] sm:$0xff] }
  0x99   :  { %v109_v12 = vpop.f32.mrf.mxu0 }
  0x9a   :  { %114 = vmax.xlane.f32.xlu0 %v109_v12 }
  0xa1   :  { %v111_v13 = vpop.f32.mrf.mxu0 }
 0x10d   :  { %v115_v17 = vpop.xlane.xlu0 %114 }
 0x10e   :  { %v116_v18 = vmax.f32 %v113_v16, %v115_v17 }
 0x110   :  { %v128_v19 = vsub.f32 %v113_v16, %v116_v18  ;;  %135 = vst.msk [vmem:[#allocation2] sm:$0xff] %vm75_vm2, %v116_v18  ;;  %119 = vperm.xlu1 %171, %v116_v18  }
 0x112   :  { %v129_v24 = vmul.f32 1.442695, %v128_v19 }
 0x117   :  { %v139_v33 = vld [vmem:[#allocation2] sm:$0xff] }
 0x182   :  { %v120_v20 = vpop.permute.xlu1 %119 }
 0x183   :  { %v122_v21 = vsub.f32 %v109_v12, %v120_v20 }
 0x185   :  { %v123_v22 = vmul.f32 1.442695, %v122_v21 }
 0x187   :  { %173 = vpow2.f32 %v123_v22 }
 0x188   :  { %175 = vpow2.f32 %v129_v24 }
 0x18d   :  { %v174_v23 = vpop.eup %173 }
 0x18e   :  { %125 = vadd.xlane.f32.xlu1 %v174_v23  ;;  %v176_v25 = vpop.eup %175 }
 0x18f   :  { %v131_v27 = vmul.f32 %v176_v25, %v127_v26 }
 0x201   :  { %v126_v28 = vpop.xlane.xlu1 %125 }
 0x202   :  { %v132_v29 = vadd.f32 %v131_v27, %v126_v28 }
 0x204   :  { %134 = vst.msk [vmem:[#allocation3] sm:$0xff] %vm75_vm2, %v132_v29 }
 0x20b   :  { %v140_v30 = vld [vmem:[#allocation3] sm:$0xff] }
 0x20c   :  { %177 = vlog2.f32 %v140_v30 }
 0x212   :  { %v178_v31 = vpop.eup %177 }
 0x213   :  { %v142_v32 = vmul.f32 0.6931472, %v178_v31 }
 0x215   :  { %v143_v34 = vadd.f32 %v142_v32, %v139_v33 }
 0x217   :  { %v145_v36 = vsub.f32 %v143_v34, %v144_v35 }
 0x219   :  { %146 = vst.msk [vmem:[%s303_s3] sm:$0xff] %vm75_vm2, %v145_v36 }
 0x21a   :  { %151 = vsyncpa [#allocation7], 1 }
 0x21b   :  { %152 = vsyncpa [#allocation9], 1 }

</bundles_post_ra>
